<compile_context>
chip_gen: v5e
topology: v5e:2x2
jax: 0.10.0
libtpu: 0.0.40
codegen_flags: <defaults>
</compile_context>

<pallas_src>
import functools

import jax
import jax.numpy as jnp
from jax.experimental import pallas as pl
from jax.experimental.pallas import tpu as pltpu

BINS = 10
ALPHA = 0.5


def _round_up(v, m):
    return -(-v // m) * m


def _make_ghm_kernel(n_rows, n_cols, tile_rows, tiles_per_core, num_splits, bins):
    real_tiles = pl.cdiv(n_rows, tile_rows)
    # Masked branch is only generated if some tile can contain rows >= n_rows.
    ragged = (n_rows % tile_rows != 0) or (num_splits * tiles_per_core != real_tiles)
    groups = tile_rows // 8          # tile_rows is always a multiple of 8

    def kernel(x_ref, t_ref, cnt_ref, sum_ref):
        core = pl.program_id(0)
        step = pl.program_id(1)

        @pl.when(step == 0)
        def _init():
            cnt_ref[...] = jnp.zeros_like(cnt_ref)
            sum_ref[...] = jnp.zeros_like(sum_ref)

        x = x_ref[...]
        t = t_ref[...]

        # Numerically stable sigmoid + BCE sharing one exp and one log per element.
        e = jnp.exp(-jnp.abs(x))                        # exp(-|x|) in (0, 1]
        sig_abs = pl.reciprocal(1.0 + e, approx=True)   # EUP slot, off the VALU
        sig = jnp.where(x >= 0.0, sig_abs, 1.0 - sig_abs)
        g = jnp.abs(sig - t)                            # GHM gradient norm
        bin_f = jnp.floor(g * (bins - 0.0001))          # float bin id (exact integers)
        # BCE-with-logits: max(x,0) - x*t + log(1 + exp(-|x|))
        bce = jnp.maximum(x, 0.0) - x * t + jnp.log(1.0 + e)

        def accumulate(bin_sel):
            cnt_pieces, sum_pieces = [], []
            for i in range(bins):
                m = bin_sel == float(i)
                # Reduce over row groups only -> vreg-aligned (8, C) pieces; the
                # cross-sublane / cross-lane reductions are deferred to the wrapper.
                # Keep select-based masking: padded-row garbage must not leak via 0*NaN.
                ones = jnp.where(m, 1.0, 0.0).reshape(groups, 8, n_cols)
                vals = jnp.where(m, bce, 0.0).reshape(groups, 8, n_cols)
                cnt_pieces.append(jnp.sum(ones, axis=0))    # (8, C)
                sum_pieces.append(jnp.sum(vals, axis=0))    # (8, C)
            # One aligned accumulate per quantity (not 2*BINS masked single-row RMWs).
            cnt_ref[...] += jnp.stack(cnt_pieces, axis=0)   # (BINS, 8, C)
            sum_ref[...] += jnp.stack(sum_pieces, axis=0)   # (BINS, 8, C)

        if not ragged:
            accumulate(bin_f)
        else:
            row0 = (core * tiles_per_core + step) * tile_rows
            is_full = row0 + tile_rows <= n_rows

            @pl.when(is_full)
            def _hot():                                 # hot path: no row mask
                accumulate(bin_f)

            @pl.when(jnp.logical_not(is_full))
            def _tail():                                # only ragged / overhang tiles
                row = jax.lax.broadcasted_iota(jnp.int32, x.shape, 0) + row0
                accumulate(jnp.where(row < n_rows, bin_f, -1.0))   # sentinel: no bin

    return kernel


def _pick_tile_rows(n_rows, n_cols, budget_bytes=24 * 1024 * 1024):
    """Row-tile size from a VMEM byte budget.

    ~8 tile-sized f32 buffers are live at once (2 inputs x 2 pipeline buffers plus
    ~4 temporaries e/bce/sig/bin); budget <= ~24 MiB fits v7x (64 MiB VMEM) with
    headroom and amortizes the ~0.35 us per-grid-step overhead on v5e/v6e.
    """
    per_row = 8 * n_cols * 4
    tm = max(8, min(budget_bytes // per_row, 1024))
    tm = (tm // 8) * 8
    return int(min(tm, _round_up(n_rows, 8)))


@functools.partial(jax.jit, static_argnames=("tile_rows", "num_splits"))
def _ghm_forward(coef, last_counts, x, target, *, tile_rows, num_splits):
    n, c = x.shape
    real_tiles = pl.cdiv(n, tile_rows)
    tiles_per_core = pl.cdiv(real_tiles, num_splits)
    needs_clamp = num_splits * tiles_per_core != real_tiles

    def row_map(core, i):
        tile = core * tiles_per_core + i
        if needs_clamp:
            # Overhang tiles re-read the last valid tile (no OOB DMA); their rows are
            # >= n_rows when computed from the *unclamped* index, so the in-kernel
            # mask excludes them from every bin.
            tile = jnp.minimum(tile, real_tiles - 1)
        return (tile, 0)

    kernel = _make_ghm_kernel(n, c, tile_rows, tiles_per_core, num_splits, BINS)

    tile_bytes = tile_rows * c * 4
    acc_bytes = 2 * BINS * 8 * c * 4
    est = 8 * tile_bytes + 2 * acc_bytes
    vmem_limit = int(min(48 * 1024 * 1024, max(16 * 1024 * 1024, 2 * est)))

    cnt_p, sum_p = pl.pallas_call(
        kernel,
        grid=(num_splits, tiles_per_core),
        out_shape=(
            jax.ShapeDtypeStruct((num_splits, BINS, 8, c), jnp.float32),
            jax.ShapeDtypeStruct((num_splits, BINS, 8, c), jnp.float32),
        ),
        in_specs=[
            pl.BlockSpec((tile_rows, c), row_map),             # x row tile
            pl.BlockSpec((tile_rows, c), row_map),             # target row tile
        ],
        out_specs=(
            pl.BlockSpec((None, BINS, 8, c), lambda core, i: (core, 0, 0, 0)),
            pl.BlockSpec((None, BINS, 8, c), lambda core, i: (core, 0, 0, 0)),
        ),
        compiler_params=pltpu.CompilerParams(
            # Leading axis "parallel": splits the row range across both TensorCores on
            # v7x; the trailing "arbitrary" axis carries the per-core reduction.
            dimension_semantics=("parallel", "arbitrary"),
            vmem_limit_bytes=vmem_limit,
        ),
    )(x, target)

    # Finalize: 10-element math in plain XLA (free), enabling the per-core split above.
    raw = jnp.sum(cnt_p, axis=(0, 2, 3))           # (BINS,) raw histogram
    bce_sum = jnp.sum(sum_p, axis=(0, 2, 3))       # (BINS,) per-bin BCE sums
    n_elems = jnp.float32(n * c)                   # N = x.size(0) * x.size(1)
    blended = coef[0] * last_counts + coef[1] * raw            # EMA blend
    nonempty = jnp.sum((blended > 0.0).astype(jnp.float32))
    gd = jnp.maximum(blended * nonempty, 0.0001)
    beta = n_elems / gd
    loss = jnp.sum(beta * bce_sum) / n_elems
    return loss, blended


class GHMCLossPallas:
    """GHM_Loss (bins=10, alpha=0.5) with the standard GHM-C custom loss/grad."""

    def __init__(self, bins=BINS, alpha=ALPHA, block_rows=None, num_core_splits=2):
        assert bins == BINS, "kernel is specialized to BINS"
        self._bins = bins
        self._alpha = alpha
        self._block_rows = block_rows            # None -> VMEM-budget-derived tile size
        self._num_core_splits = num_core_splits  # leading "parallel" axis (2 TCs on v7x)
        self._last_bin_count = None              # Python-side state, like the nn.Module

    def __call__(self, x, target):
        n, c = x.shape
        tm = self._block_rows if self._block_rows is not None else _pick_tile_rows(n, c)
        tm = int(min(_round_up(max(int(tm), 8), 8), _round_up(n, 8)))
        real_tiles = -(-n // tm)
        splits = int(max(1, min(self._num_core_splits, real_tiles)))
        if self._last_bin_count is None:
            coef = jnp.array([0.0, 1.0], dtype=jnp.float32)     # first call: blended = raw
            last = jnp.zeros((self._bins,), dtype=jnp.float32)
        else:
            coef = jnp.array([self._alpha, 1.0 - self._alpha], dtype=jnp.float32)
            last = self._last_bin_count
        loss, new_counts = _ghm_forward(coef, last, x, target,
                                        tile_rows=tm, num_splits=splits)
        self._last_bin_count = new_counts
        return loss


def _ghm_reference(x, target, last_counts, alpha, bins=BINS):
    """Pure-JAX reference of the same GHM-C forward (for a sanity check)."""
    sig = jax.nn.sigmoid(x)
    g = jnp.abs(sig - target)
    bin_idx = jnp.floor(g * (bins - 0.0001)).astype(jnp.int32)
    raw = jnp.sum(jax.nn.one_hot(bin_idx, bins, dtype=jnp.float32), axis=(0, 1))
    blended = raw if last_counts is None else alpha * last_counts + (1 - alpha) * raw
    n = x.shape[0] * x.shape[1]
    nonempty = jnp.sum((blended > 0).astype(jnp.float32))
    gd = jnp.maximum(blended * nonempty, 0.0001)
    beta = n / gd
    w = beta[bin_idx]
    bce = jnp.maximum(x, 0.0) - x * target + jnp.log1p(jnp.exp(-jnp.abs(x)))
    return jnp.mean(w * bce), blended


if __name__ == "__main__":
    key = jax.random.PRNGKey(0)
    kx, kt, kx2 = jax.random.split(key, 3)
    # Small shapes: 20 rows x 128 classes. block_rows=8 -> grid (2, 2): a 2-way core
    # split plus a ragged last tile and a fully-masked overhang tile, exercising the
    # streaming, masking and parallel-axis paths of the kernel.
    N, C = 20, 128
    x = jax.random.normal(kx, (N, C), dtype=jnp.float32) * 2.0
    target = (jax.random.uniform(kt, (N, C)) > 0.5).astype(jnp.float32)

    ghm = GHMCLossPallas(bins=BINS, alpha=ALPHA, block_rows=8, num_core_splits=2)

    loss1 = ghm(x, target)                               # first call: raw histogram
    ref1, ref_cnt1 = _ghm_reference(x, target, None, ALPHA)

    x2 = jax.random.normal(kx2, (N, C), dtype=jnp.float32) * 2.0
    loss2 = ghm(x2, target)                              # second call: EMA-blended path
    ref2, _ = _ghm_reference(x2, target, ref_cnt1, ALPHA)

    # Also exercise the default (budget-sized, single-tile) path once.
    ghm_big = GHMCLossPallas(bins=BINS, alpha=ALPHA)
    loss3 = ghm_big(x, target)

    jax.block_until_ready((loss1, loss2, loss3, ghm._last_bin_count))

    # The histogram must account for every element exactly (raw counts are exact f32 sums).
    assert abs(float(jnp.sum(ghm_big._last_bin_count)) - N * C) < 0.5

    # Tolerance note: the approx-reciprocal sigmoid (EUP) can flip a handful of elements
    # across a gradient-norm bin boundary at this tiny size, shifting the loss by a few
    # percent at most; real bugs (binning / normalization) move it by far more than 5%.
    def close(a, b, tol=5e-2):
        return abs(float(a) - float(b)) <= tol * max(1.0, abs(float(b)))

    assert close(loss1, ref1)
    assert close(loss2, ref2)
    assert close(loss3, ref1)
    print("KERNEL_OK")
</pallas_src>

<mosaic_0001>
module attributes {stable_mosaic.version = 11 : i64} {
  func.func @kernel(%arg0: i32, %arg1: i32, %arg2: memref<8x128xf32, #tpu.memory_space<vmem>>, %arg3: memref<8x128xf32, #tpu.memory_space<vmem>>, %arg4: memref<1x10x8x128xf32, #tpu.memory_space<vmem>>, %arg5: memref<1x10x8x128xf32, #tpu.memory_space<vmem>>) attributes {dimension_semantics = [#tpu.dimension_semantics<parallel>, #tpu.dimension_semantics<arbitrary>], iteration_bounds = array<i64: 2, 2>, scalar_prefetch = 0 : i64, scratch_operands = 0 : i64, tpu.core_type = #tpu.core_type<tc>, window_params = [{transform_indices = @transform_0, window_bounds = array<i64: 8, 128>}, {transform_indices = @transform_1, window_bounds = array<i64: 8, 128>}, {transform_indices = @transform_2, window_bounds = array<i64: 1, 10, 8, 128>}, {transform_indices = @transform_3, window_bounds = array<i64: 1, 10, 8, 128>}]} {
    %c0_i32 = arith.constant 0 : i32
    %0 = arith.cmpi eq, %arg1, %c0_i32 : i32
    %1 = arith.extui %0 : i1 to i32
    %c0_i32_0 = arith.constant 0 : i32
    %2 = arith.cmpi ne, %1, %c0_i32_0 : i32
    scf.if %2 {
      %cst_13 = arith.constant 0.000000e+00 : f32
      %40 = vector.broadcast %cst_13 : f32 to vector<10x8x128xf32>
      %c0_14 = arith.constant 0 : index
      %c0_15 = arith.constant 0 : index
      %c0_16 = arith.constant 0 : index
      %c0_17 = arith.constant 0 : index
      %41 = vector.load %arg4[%c0_14, %c0_15, %c0_16, %c0_17] : memref<1x10x8x128xf32, #tpu.memory_space<vmem>>, vector<1x10x8x128xf32>
      %42 = vector.shape_cast %41 : vector<1x10x8x128xf32> to vector<10x8x128xf32>
      %43 = vector.shape_cast %40 : vector<10x8x128xf32> to vector<1x10x8x128xf32>
      tpu.vector_store %arg4[%c0_14, %c0_15, %c0_16, %c0_17], %43 {strides = array<i32>} : memref<1x10x8x128xf32, #tpu.memory_space<vmem>>, vector<1x10x8x128xf32>,
      %cst_18 = arith.constant 0.000000e+00 : f32
      %44 = vector.broadcast %cst_18 : f32 to vector<10x8x128xf32>
      %c0_19 = arith.constant 0 : index
      %c0_20 = arith.constant 0 : index
      %c0_21 = arith.constant 0 : index
      %c0_22 = arith.constant 0 : index
      %45 = vector.load %arg5[%c0_19, %c0_20, %c0_21, %c0_22] : memref<1x10x8x128xf32, #tpu.memory_space<vmem>>, vector<1x10x8x128xf32>
      %46 = vector.shape_cast %45 : vector<1x10x8x128xf32> to vector<10x8x128xf32>
      %47 = vector.shape_cast %44 : vector<10x8x128xf32> to vector<1x10x8x128xf32>
      tpu.vector_store %arg5[%c0_19, %c0_20, %c0_21, %c0_22], %47 {strides = array<i32>} : memref<1x10x8x128xf32, #tpu.memory_space<vmem>>, vector<1x10x8x128xf32>,
    } else {
    }
    %c0 = arith.constant 0 : index
    %c0_1 = arith.constant 0 : index
    %3 = vector.load %arg2[%c0, %c0_1] : memref<8x128xf32, #tpu.memory_space<vmem>>, vector<8x128xf32>
    %c0_2 = arith.constant 0 : index
    %c0_3 = arith.constant 0 : index
    %4 = vector.load %arg3[%c0_2, %c0_3] : memref<8x128xf32, #tpu.memory_space<vmem>>, vector<8x128xf32>
    %5 = math.absf %3 : vector<8x128xf32>
    %cst = arith.constant 0.000000e+00 : f32
    %6 = vector.broadcast %cst : f32 to vector<8x128xf32>
    %7 = arith.subf %6, %5 : vector<8x128xf32>
    %8 = math.exp %7 : vector<8x128xf32>
    %cst_4 = arith.constant 1.000000e+00 : f32
    %9 = vector.broadcast %cst_4 : f32 to vector<8x128xf32>
    %10 = arith.addf %9, %8 : vector<8x128xf32>
    %11 = tpu.reciprocal %10 {approx = true} : vector<8x128xf32> -> vector<8x128xf32>
    %cst_5 = arith.constant 0.000000e+00 : f32
    %12 = vector.broadcast %cst_5 : f32 to vector<8x128xf32>
    %13 = arith.cmpf oge, %3, %12 : vector<8x128xf32>
    %cst_6 = arith.constant 1.000000e+00 : f32
    %14 = vector.broadcast %cst_6 : f32 to vector<8x128xf32>
    %15 = arith.subf %14, %11 : vector<8x128xf32>
    %16 = arith.select %13, %11, %15 : vector<8x128xi1>, vector<8x128xf32>
    %17 = arith.subf %16, %4 : vector<8x128xf32>
    %18 = math.absf %17 : vector<8x128xf32>
    %cst_7 = arith.constant 9.99989986 : f32
    %19 = vector.broadcast %cst_7 : f32 to vector<8x128xf32>
    %20 = arith.mulf %18, %19 : vector<8x128xf32>
    %21 = math.floor %20 : vector<8x128xf32>
    %cst_8 = arith.constant 0.000000e+00 : f32
    %22 = vector.broadcast %cst_8 : f32 to vector<8x128xf32>
    %23 = arith.maximumf %3, %22 : vector<8x128xf32>
    %24 = arith.mulf %3, %4 : vector<8x128xf32>
    %25 = arith.subf %23, %24 : vector<8x128xf32>
    %cst_9 = arith.constant 1.000000e+00 : f32
    %26 = vector.broadcast %cst_9 : f32 to vector<8x128xf32>
    %27 = arith.addf %26, %8 : vector<8x128xf32>
    %28 = math.log %27 : vector<8x128xf32>
    %29 = arith.addf %25, %28 : vector<8x128xf32>
    %c2_i32 = arith.constant 2 : i32
    %30 = arith.muli %arg0, %c2_i32 : i32
    %31 = arith.addi %30, %arg1 : i32
    %c8_i32 = arith.constant 8 : i32
    %32 = arith.muli %31, %c8_i32 : i32
    %c8_i32_10 = arith.constant 8 : i32
    %33 = arith.addi %32, %c8_i32_10 : i32
    %c20_i32 = arith.constant 20 : i32
    %34 = arith.cmpi sle, %33, %c20_i32 : i32
    %35 = arith.extui %34 : i1 to i32
    %c0_i32_11 = arith.constant 0 : i32
    %36 = arith.cmpi ne, %35, %c0_i32_11 : i32
    scf.if %36 {
      %cst_13 = arith.constant 0.000000e+00 : f32
      %40 = vector.broadcast %cst_13 : f32 to vector<8x128xf32>
      %41 = arith.cmpf oeq, %21, %40 : vector<8x128xf32>
      %cst_14 = arith.constant 1.000000e+00 : f32
      %cst_15 = arith.constant 0.000000e+00 : f32
      %42 = vector.broadcast %cst_14 : f32 to vector<8x128xf32>
      %43 = vector.broadcast %cst_15 : f32 to vector<8x128xf32>
      %44 = arith.select %41, %42, %43 : vector<8x128xi1>, vector<8x128xf32>
      %45 = vector.shape_cast %44 : vector<8x128xf32> to vector<1x8x128xf32>
      %cst_16 = arith.constant 0.000000e+00 : f32
      %46 = vector.broadcast %cst_16 : f32 to vector<8x128xf32>
      %47 = arith.select %41, %29, %46 : vector<8x128xi1>, vector<8x128xf32>
      %48 = vector.shape_cast %47 : vector<8x128xf32> to vector<1x8x128xf32>
      %cst_17 = arith.constant dense<0.000000e+00> : vector<8x128xf32>
      %49 = vector.multi_reduction <add>, %45, %cst_17 [0] : vector<1x8x128xf32> to vector<8x128xf32>
      %cst_18 = arith.constant dense<0.000000e+00> : vector<8x128xf32>
      %50 = vector.multi_reduction <add>, %48, %cst_18 [0] : vector<1x8x128xf32> to vector<8x128xf32>
      %cst_19 = arith.constant 1.000000e+00 : f32
      %51 = vector.broadcast %cst_19 : f32 to vector<8x128xf32>
      %52 = arith.cmpf oeq, %21, %51 : vector<8x128xf32>
      %cst_20 = arith.constant 1.000000e+00 : f32
      %cst_21 = arith.constant 0.000000e+00 : f32
      %53 = vector.broadcast %cst_20 : f32 to vector<8x128xf32>
      %54 = vector.broadcast %cst_21 : f32 to vector<8x128xf32>
      %55 = arith.select %52, %53, %54 : vector<8x128xi1>, vector<8x128xf32>
      %56 = vector.shape_cast %55 : vector<8x128xf32> to vector<1x8x128xf32>
      %cst_22 = arith.constant 0.000000e+00 : f32
      %57 = vector.broadcast %cst_22 : f32 to vector<8x128xf32>
      %58 = arith.select %52, %29, %57 : vector<8x128xi1>, vector<8x128xf32>
      %59 = vector.shape_cast %58 : vector<8x128xf32> to vector<1x8x128xf32>
      %cst_23 = arith.constant dense<0.000000e+00> : vector<8x128xf32>
      %60 = vector.multi_reduction <add>, %56, %cst_23 [0] : vector<1x8x128xf32> to vector<8x128xf32>
      %cst_24 = arith.constant dense<0.000000e+00> : vector<8x128xf32>
      %61 = vector.multi_reduction <add>, %59, %cst_24 [0] : vector<1x8x128xf32> to vector<8x128xf32>
      %cst_25 = arith.constant 2.000000e+00 : f32
      %62 = vector.broadcast %cst_25 : f32 to vector<8x128xf32>
      %63 = arith.cmpf oeq, %21, %62 : vector<8x128xf32>
      %cst_26 = arith.constant 1.000000e+00 : f32
      %cst_27 = arith.constant 0.000000e+00 : f32
      %64 = vector.broadcast %cst_26 : f32 to vector<8x128xf32>
      %65 = vector.broadcast %cst_27 : f32 to vector<8x128xf32>
      %66 = arith.select %63, %64, %65 : vector<8x128xi1>, vector<8x128xf32>
      %67 = vector.shape_cast %66 : vector<8x128xf32> to vector<1x8x128xf32>
      %cst_28 = arith.constant 0.000000e+00 : f32
      %68 = vector.broadcast %cst_28 : f32 to vector<8x128xf32>
      %69 = arith.select %63, %29, %68 : vector<8x128xi1>, vector<8x128xf32>
      %70 = vector.shape_cast %69 : vector<8x128xf32> to vector<1x8x128xf32>
      %cst_29 = arith.constant dense<0.000000e+00> : vector<8x128xf32>
      %71 = vector.multi_reduction <add>, %67, %cst_29 [0] : vector<1x8x128xf32> to vector<8x128xf32>
      %cst_30 = arith.constant dense<0.000000e+00> : vector<8x128xf32>
      %72 = vector.multi_reduction <add>, %70, %cst_30 [0] : vector<1x8x128xf32> to vector<8x128xf32>
      %cst_31 = arith.constant 3.000000e+00 : f32
      %73 = vector.broadcast %cst_31 : f32 to vector<8x128xf32>
      %74 = arith.cmpf oeq, %21, %73 : vector<8x128xf32>
      %cst_32 = arith.constant 1.000000e+00 : f32
      %cst_33 = arith.constant 0.000000e+00 : f32
      %75 = vector.broadcast %cst_32 : f32 to vector<8x128xf32>
      %76 = vector.broadcast %cst_33 : f32 to vector<8x128xf32>
      %77 = arith.select %74, %75, %76 : vector<8x128xi1>, vector<8x128xf32>
      %78 = vector.shape_cast %77 : vector<8x128xf32> to vector<1x8x128xf32>
      %cst_34 = arith.constant 0.000000e+00 : f32
      %79 = vector.broadcast %cst_34 : f32 to vector<8x128xf32>
      %80 = arith.select %74, %29, %79 : vector<8x128xi1>, vector<8x128xf32>
      %81 = vector.shape_cast %80 : vector<8x128xf32> to vector<1x8x128xf32>
      %cst_35 = arith.constant dense<0.000000e+00> : vector<8x128xf32>
      %82 = vector.multi_reduction <add>, %78, %cst_35 [0] : vector<1x8x128xf32> to vector<8x128xf32>
      %cst_36 = arith.constant dense<0.000000e+00> : vector<8x128xf32>
      %83 = vector.multi_reduction <add>, %81, %cst_36 [0] : vector<1x8x128xf32> to vector<8x128xf32>
      %cst_37 = arith.constant 4.000000e+00 : f32
      %84 = vector.broadcast %cst_37 : f32 to vector<8x128xf32>
      %85 = arith.cmpf oeq, %21, %84 : vector<8x128xf32>
      %cst_38 = arith.constant 1.000000e+00 : f32
      %cst_39 = arith.constant 0.000000e+00 : f32
      %86 = vector.broadcast %cst_38 : f32 to vector<8x128xf32>
      %87 = vector.broadcast %cst_39 : f32 to vector<8x128xf32>
      %88 = arith.select %85, %86, %87 : vector<8x128xi1>, vector<8x128xf32>
      %89 = vector.shape_cast %88 : vector<8x128xf32> to vector<1x8x128xf32>
      %cst_40 = arith.constant 0.000000e+00 : f32
      %90 = vector.broadcast %cst_40 : f32 to vector<8x128xf32>
      %91 = arith.select %85, %29, %90 : vector<8x128xi1>, vector<8x128xf32>
      %92 = vector.shape_cast %91 : vector<8x128xf32> to vector<1x8x128xf32>
      %cst_41 = arith.constant dense<0.000000e+00> : vector<8x128xf32>
      %93 = vector.multi_reduction <add>, %89, %cst_41 [0] : vector<1x8x128xf32> to vector<8x128xf32>
      %cst_42 = arith.constant dense<0.000000e+00> : vector<8x128xf32>
      %94 = vector.multi_reduction <add>, %92, %cst_42 [0] : vector<1x8x128xf32> to vector<8x128xf32>
      %cst_43 = arith.constant 5.000000e+00 : f32
      %95 = vector.broadcast %cst_43 : f32 to vector<8x128xf32>
      %96 = arith.cmpf oeq, %21, %95 : vector<8x128xf32>
      %cst_44 = arith.constant 1.000000e+00 : f32
      %cst_45 = arith.constant 0.000000e+00 : f32
      %97 = vector.broadcast %cst_44 : f32 to vector<8x128xf32>
      %98 = vector.broadcast %cst_45 : f32 to vector<8x128xf32>
      %99 = arith.select %96, %97, %98 : vector<8x128xi1>, vector<8x128xf32>
      %100 = vector.shape_cast %99 : vector<8x128xf32> to vector<1x8x128xf32>
      %cst_46 = arith.constant 0.000000e+00 : f32
      %101 = vector.broadcast %cst_46 : f32 to vector<8x128xf32>
      %102 = arith.select %96, %29, %101 : vector<8x128xi1>, vector<8x128xf32>
      %103 = vector.shape_cast %102 : vector<8x128xf32> to vector<1x8x128xf32>
      %cst_47 = arith.constant dense<0.000000e+00> : vector<8x128xf32>
      %104 = vector.multi_reduction <add>, %100, %cst_47 [0] : vector<1x8x128xf32> to vector<8x128xf32>
      %cst_48 = arith.constant dense<0.000000e+00> : vector<8x128xf32>
      %105 = vector.multi_reduction <add>, %103, %cst_48 [0] : vector<1x8x128xf32> to vector<8x128xf32>
      %cst_49 = arith.constant 6.000000e+00 : f32
      %106 = vector.broadcast %cst_49 : f32 to vector<8x128xf32>
      %107 = arith.cmpf oeq, %21, %106 : vector<8x128xf32>
      %cst_50 = arith.constant 1.000000e+00 : f32
      %cst_51 = arith.constant 0.000000e+00 : f32
      %108 = vector.broadcast %cst_50 : f32 to vector<8x128xf32>
      %109 = vector.broadcast %cst_51 : f32 to vector<8x128xf32>
      %110 = arith.select %107, %108, %109 : vector<8x128xi1>, vector<8x128xf32>
      %111 = vector.shape_cast %110 : vector<8x128xf32> to vector<1x8x128xf32>
      %cst_52 = arith.constant 0.000000e+00 : f32
      %112 = vector.broadcast %cst_52 : f32 to vector<8x128xf32>
      %113 = arith.select %107, %29, %112 : vector<8x128xi1>, vector<8x128xf32>
      %114 = vector.shape_cast %113 : vector<8x128xf32> to vector<1x8x128xf32>
      %cst_53 = arith.constant dense<0.000000e+00> : vector<8x128xf32>
      %115 = vector.multi_reduction <add>, %111, %cst_53 [0] : vector<1x8x128xf32> to vector<8x128xf32>
      %cst_54 = arith.constant dense<0.000000e+00> : vector<8x128xf32>
      %116 = vector.multi_reduction <add>, %114, %cst_54 [0] : vector<1x8x128xf32> to vector<8x128xf32>
      %cst_55 = arith.constant 7.000000e+00 : f32
      %117 = vector.broadcast %cst_55 : f32 to vector<8x128xf32>
      %118 = arith.cmpf oeq, %21, %117 : vector<8x128xf32>
      %cst_56 = arith.constant 1.000000e+00 : f32
      %cst_57 = arith.constant 0.000000e+00 : f32
      %119 = vector.broadcast %cst_56 : f32 to vector<8x128xf32>
      %120 = vector.broadcast %cst_57 : f32 to vector<8x128xf32>
      %121 = arith.select %118, %119, %120 : vector<8x128xi1>, vector<8x128xf32>
      %122 = vector.shape_cast %121 : vector<8x128xf32> to vector<1x8x128xf32>
      %cst_58 = arith.constant 0.000000e+00 : f32
      %123 = vector.broadcast %cst_58 : f32 to vector<8x128xf32>
      %124 = arith.select %118, %29, %123 : vector<8x128xi1>, vector<8x128xf32>
      %125 = vector.shape_cast %124 : vector<8x128xf32> to vector<1x8x128xf32>
      %cst_59 = arith.constant dense<0.000000e+00> : vector<8x128xf32>
      %126 = vector.multi_reduction <add>, %122, %cst_59 [0] : vector<1x8x128xf32> to vector<8x128xf32>
      %cst_60 = arith.constant dense<0.000000e+00> : vector<8x128xf32>
      %127 = vector.multi_reduction <add>, %125, %cst_60 [0] : vector<1x8x128xf32> to vector<8x128xf32>
      %cst_61 = arith.constant 8.000000e+00 : f32
      %128 = vector.broadcast %cst_61 : f32 to vector<8x128xf32>
      %129 = arith.cmpf oeq, %21, %128 : vector<8x128xf32>
      %cst_62 = arith.constant 1.000000e+00 : f32
      %cst_63 = arith.constant 0.000000e+00 : f32
      %130 = vector.broadcast %cst_62 : f32 to vector<8x128xf32>
      %131 = vector.broadcast %cst_63 : f32 to vector<8x128xf32>
      %132 = arith.select %129, %130, %131 : vector<8x128xi1>, vector<8x128xf32>
      %133 = vector.shape_cast %132 : vector<8x128xf32> to vector<1x8x128xf32>
      %cst_64 = arith.constant 0.000000e+00 : f32
      %134 = vector.broadcast %cst_64 : f32 to vector<8x128xf32>
      %135 = arith.select %129, %29, %134 : vector<8x128xi1>, vector<8x128xf32>
      %136 = vector.shape_cast %135 : vector<8x128xf32> to vector<1x8x128xf32>
      %cst_65 = arith.constant dense<0.000000e+00> : vector<8x128xf32>
      %137 = vector.multi_reduction <add>, %133, %cst_65 [0] : vector<1x8x128xf32> to vector<8x128xf32>
      %cst_66 = arith.constant dense<0.000000e+00> : vector<8x128xf32>
      %138 = vector.multi_reduction <add>, %136, %cst_66 [0] : vector<1x8x128xf32> to vector<8x128xf32>
      %cst_67 = arith.constant 9.000000e+00 : f32
      %139 = vector.broadcast %cst_67 : f32 to vector<8x128xf32>
      %140 = arith.cmpf oeq, %21, %139 : vector<8x128xf32>
      %cst_68 = arith.constant 1.000000e+00 : f32
      %cst_69 = arith.constant 0.000000e+00 : f32
      %141 = vector.broadcast %cst_68 : f32 to vector<8x128xf32>
      %142 = vector.broadcast %cst_69 : f32 to vector<8x128xf32>
      %143 = arith.select %140, %141, %142 : vector<8x128xi1>, vector<8x128xf32>
      %144 = vector.shape_cast %143 : vector<8x128xf32> to vector<1x8x128xf32>
      %cst_70 = arith.constant 0.000000e+00 : f32
      %145 = vector.broadcast %cst_70 : f32 to vector<8x128xf32>
      %146 = arith.select %140, %29, %145 : vector<8x128xi1>, vector<8x128xf32>
      %147 = vector.shape_cast %146 : vector<8x128xf32> to vector<1x8x128xf32>
      %cst_71 = arith.constant dense<0.000000e+00> : vector<8x128xf32>
      %148 = vector.multi_reduction <add>, %144, %cst_71 [0] : vector<1x8x128xf32> to vector<8x128xf32>
      %cst_72 = arith.constant dense<0.000000e+00> : vector<8x128xf32>
      %149 = vector.multi_reduction <add>, %147, %cst_72 [0] : vector<1x8x128xf32> to vector<8x128xf32>
      %c0_73 = arith.constant 0 : index
      %c0_74 = arith.constant 0 : index
      %c0_75 = arith.constant 0 : index
      %c0_76 = arith.constant 0 : index
      %150 = vector.load %arg4[%c0_73, %c0_74, %c0_75, %c0_76] : memref<1x10x8x128xf32, #tpu.memory_space<vmem>>, vector<1x10x8x128xf32>
      %151 = vector.shape_cast %150 : vector<1x10x8x128xf32> to vector<10x8x128xf32>
      %152 = vector.shape_cast %49 : vector<8x128xf32> to vector<1x8x128xf32>
      %153 = vector.shape_cast %60 : vector<8x128xf32> to vector<1x8x128xf32>
      %154 = vector.shape_cast %71 : vector<8x128xf32> to vector<1x8x128xf32>
      %155 = vector.shape_cast %82 : vector<8x128xf32> to vector<1x8x128xf32>
      %156 = vector.shape_cast %93 : vector<8x128xf32> to vector<1x8x128xf32>
      %157 = vector.shape_cast %104 : vector<8x128xf32> to vector<1x8x128xf32>
      %158 = vector.shape_cast %115 : vector<8x128xf32> to vector<1x8x128xf32>
      %159 = vector.shape_cast %126 : vector<8x128xf32> to vector<1x8x128xf32>
      %160 = vector.shape_cast %137 : vector<8x128xf32> to vector<1x8x128xf32>
      %161 = vector.shape_cast %148 : vector<8x128xf32> to vector<1x8x128xf32>
      %162 = tpu.concatenate %152, %153, %154, %155, %156, %157, %158, %159, %160, %161 in 0 : vector<1x8x128xf32>, vector<1x8x128xf32>, vector<1x8x128xf32>, vector<1x8x128xf32>, vector<1x8x128xf32>, vector<1x8x128xf32>, vector<1x8x128xf32>, vector<1x8x128xf32>, vector<1x8x128xf32>, vector<1x8x128xf32> -> vector<10x8x128xf32>
      %163 = arith.addf %151, %162 : vector<10x8x128xf32>
      %c0_77 = arith.constant 0 : index
      %c0_78 = arith.constant 0 : index
      %c0_79 = arith.constant 0 : index
      %c0_80 = arith.constant 0 : index
      %164 = vector.load %arg4[%c0_77, %c0_78, %c0_79, %c0_80] : memref<1x10x8x128xf32, #tpu.memory_space<vmem>>, vector<1x10x8x128xf32>
      %165 = vector.shape_cast %164 : vector<1x10x8x128xf32> to vector<10x8x128xf32>
      %166 = vector.shape_cast %163 : vector<10x8x128xf32> to vector<1x10x8x128xf32>
      tpu.vector_store %arg4[%c0_77, %c0_78, %c0_79, %c0_80], %166 {strides = array<i32>} : memref<1x10x8x128xf32, #tpu.memory_space<vmem>>, vector<1x10x8x128xf32>,
      %c0_81 = arith.constant 0 : index
      %c0_82 = arith.constant 0 : index
      %c0_83 = arith.constant 0 : index
      %c0_84 = arith.constant 0 : index
      %167 = vector.load %arg5[%c0_81, %c0_82, %c0_83, %c0_84] : memref<1x10x8x128xf32, #tpu.memory_space<vmem>>, vector<1x10x8x128xf32>
      %168 = vector.shape_cast %167 : vector<1x10x8x128xf32> to vector<10x8x128xf32>
      %169 = vector.shape_cast %50 : vector<8x128xf32> to vector<1x8x128xf32>
      %170 = vector.shape_cast %61 : vector<8x128xf32> to vector<1x8x128xf32>
      %171 = vector.shape_cast %72 : vector<8x128xf32> to vector<1x8x128xf32>
      %172 = vector.shape_cast %83 : vector<8x128xf32> to vector<1x8x128xf32>
      %173 = vector.shape_cast %94 : vector<8x128xf32> to vector<1x8x128xf32>
      %174 = vector.shape_cast %105 : vector<8x128xf32> to vector<1x8x128xf32>
      %175 = vector.shape_cast %116 : vector<8x128xf32> to vector<1x8x128xf32>
      %176 = vector.shape_cast %127 : vector<8x128xf32> to vector<1x8x128xf32>
      %177 = vector.shape_cast %138 : vector<8x128xf32> to vector<1x8x128xf32>
      %178 = vector.shape_cast %149 : vector<8x128xf32> to vector<1x8x128xf32>
      %179 = tpu.concatenate %169, %170, %171, %172, %173, %174, %175, %176, %177, %178 in 0 : vector<1x8x128xf32>, vector<1x8x128xf32>, vector<1x8x128xf32>, vector<1x8x128xf32>, vector<1x8x128xf32>, vector<1x8x128xf32>, vector<1x8x128xf32>, vector<1x8x128xf32>, vector<1x8x128xf32>, vector<1x8x128xf32> -> vector<10x8x128xf32>
      %180 = arith.addf %168, %179 : vector<10x8x128xf32>
      %c0_85 = arith.constant 0 : index
      %c0_86 = arith.constant 0 : index
      %c0_87 = arith.constant 0 : index
      %c0_88 = arith.constant 0 : index
      %181 = vector.load %arg5[%c0_85, %c0_86, %c0_87, %c0_88] : memref<1x10x8x128xf32, #tpu.memory_space<vmem>>, vector<1x10x8x128xf32>
      %182 = vector.shape_cast %181 : vector<1x10x8x128xf32> to vector<10x8x128xf32>
      %183 = vector.shape_cast %180 : vector<10x8x128xf32> to vector<1x10x8x128xf32>
      tpu.vector_store %arg5[%c0_85, %c0_86, %c0_87, %c0_88], %183 {strides = array<i32>} : memref<1x10x8x128xf32, #tpu.memory_space<vmem>>, vector<1x10x8x128xf32>,
    } else {
    }
    %true = arith.constant true
    %37 = arith.xori %34, %true : i1
    %38 = arith.extui %37 : i1 to i32
    %c0_i32_12 = arith.constant 0 : i32
    %39 = arith.cmpi ne, %38, %c0_i32_12 : i32
    scf.if %39 {
      %40 = tpu.iota {dimensions = array<i32: 0>} : vector<8x128xi32>
      %41 = vector.broadcast %32 : i32 to vector<8x128xi32>
      %42 = arith.addi %40, %41 : vector<8x128xi32>
      %c20_i32_13 = arith.constant 20 : i32
      %43 = vector.broadcast %c20_i32_13 : i32 to vector<8x128xi32>
      %44 = arith.cmpi slt, %42, %43 : vector<8x128xi32>
      %cst_14 = arith.constant -1.000000e+00 : f32
      %45 = vector.broadcast %cst_14 : f32 to vector<8x128xf32>
      %46 = arith.select %44, %21, %45 : vector<8x128xi1>, vector<8x128xf32>
      %cst_15 = arith.constant 0.000000e+00 : f32
      %47 = vector.broadcast %cst_15 : f32 to vector<8x128xf32>
      %48 = arith.cmpf oeq, %46, %47 : vector<8x128xf32>
      %cst_16 = arith.constant 1.000000e+00 : f32
      %cst_17 = arith.constant 0.000000e+00 : f32
      %49 = vector.broadcast %cst_16 : f32 to vector<8x128xf32>
      %50 = vector.broadcast %cst_17 : f32 to vector<8x128xf32>
      %51 = arith.select %48, %49, %50 : vector<8x128xi1>, vector<8x128xf32>
      %52 = vector.shape_cast %51 : vector<8x128xf32> to vector<1x8x128xf32>
      %cst_18 = arith.constant 0.000000e+00 : f32
      %53 = vector.broadcast %cst_18 : f32 to vector<8x128xf32>
      %54 = arith.select %48, %29, %53 : vector<8x128xi1>, vector<8x128xf32>
      %55 = vector.shape_cast %54 : vector<8x128xf32> to vector<1x8x128xf32>
      %cst_19 = arith.constant dense<0.000000e+00> : vector<8x128xf32>
      %56 = vector.multi_reduction <add>, %52, %cst_19 [0] : vector<1x8x128xf32> to vector<8x128xf32>
      %cst_20 = arith.constant dense<0.000000e+00> : vector<8x128xf32>
      %57 = vector.multi_reduction <add>, %55, %cst_20 [0] : vector<1x8x128xf32> to vector<8x128xf32>
      %cst_21 = arith.constant 1.000000e+00 : f32
      %58 = vector.broadcast %cst_21 : f32 to vector<8x128xf32>
      %59 = arith.cmpf oeq, %46, %58 : vector<8x128xf32>
      %cst_22 = arith.constant 1.000000e+00 : f32
      %cst_23 = arith.constant 0.000000e+00 : f32
      %60 = vector.broadcast %cst_22 : f32 to vector<8x128xf32>
      %61 = vector.broadcast %cst_23 : f32 to vector<8x128xf32>
      %62 = arith.select %59, %60, %61 : vector<8x128xi1>, vector<8x128xf32>
      %63 = vector.shape_cast %62 : vector<8x128xf32> to vector<1x8x128xf32>
      %cst_24 = arith.constant 0.000000e+00 : f32
      %64 = vector.broadcast %cst_24 : f32 to vector<8x128xf32>
      %65 = arith.select %59, %29, %64 : vector<8x128xi1>, vector<8x128xf32>
      %66 = vector.shape_cast %65 : vector<8x128xf32> to vector<1x8x128xf32>
      %cst_25 = arith.constant dense<0.000000e+00> : vector<8x128xf32>
      %67 = vector.multi_reduction <add>, %63, %cst_25 [0] : vector<1x8x128xf32> to vector<8x128xf32>
      %cst_26 = arith.constant dense<0.000000e+00> : vector<8x128xf32>
      %68 = vector.multi_reduction <add>, %66, %cst_26 [0] : vector<1x8x128xf32> to vector<8x128xf32>
      %cst_27 = arith.constant 2.000000e+00 : f32
      %69 = vector.broadcast %cst_27 : f32 to vector<8x128xf32>
      %70 = arith.cmpf oeq, %46, %69 : vector<8x128xf32>
      %cst_28 = arith.constant 1.000000e+00 : f32
      %cst_29 = arith.constant 0.000000e+00 : f32
      %71 = vector.broadcast %cst_28 : f32 to vector<8x128xf32>
      %72 = vector.broadcast %cst_29 : f32 to vector<8x128xf32>
      %73 = arith.select %70, %71, %72 : vector<8x128xi1>, vector<8x128xf32>
      %74 = vector.shape_cast %73 : vector<8x128xf32> to vector<1x8x128xf32>
      %cst_30 = arith.constant 0.000000e+00 : f32
      %75 = vector.broadcast %cst_30 : f32 to vector<8x128xf32>
      %76 = arith.select %70, %29, %75 : vector<8x128xi1>, vector<8x128xf32>
      %77 = vector.shape_cast %76 : vector<8x128xf32> to vector<1x8x128xf32>
      %cst_31 = arith.constant dense<0.000000e+00> : vector<8x128xf32>
      %78 = vector.multi_reduction <add>, %74, %cst_31 [0] : vector<1x8x128xf32> to vector<8x128xf32>
      %cst_32 = arith.constant dense<0.000000e+00> : vector<8x128xf32>
      %79 = vector.multi_reduction <add>, %77, %cst_32 [0] : vector<1x8x128xf32> to vector<8x128xf32>
      %cst_33 = arith.constant 3.000000e+00 : f32
      %80 = vector.broadcast %cst_33 : f32 to vector<8x128xf32>
      %81 = arith.cmpf oeq, %46, %80 : vector<8x128xf32>
      %cst_34 = arith.constant 1.000000e+00 : f32
      %cst_35 = arith.constant 0.000000e+00 : f32
      %82 = vector.broadcast %cst_34 : f32 to vector<8x128xf32>
      %83 = vector.broadcast %cst_35 : f32 to vector<8x128xf32>
      %84 = arith.select %81, %82, %83 : vector<8x128xi1>, vector<8x128xf32>
      %85 = vector.shape_cast %84 : vector<8x128xf32> to vector<1x8x128xf32>
      %cst_36 = arith.constant 0.000000e+00 : f32
      %86 = vector.broadcast %cst_36 : f32 to vector<8x128xf32>
      %87 = arith.select %81, %29, %86 : vector<8x128xi1>, vector<8x128xf32>
      %88 = vector.shape_cast %87 : vector<8x128xf32> to vector<1x8x128xf32>
      %cst_37 = arith.constant dense<0.000000e+00> : vector<8x128xf32>
      %89 = vector.multi_reduction <add>, %85, %cst_37 [0] : vector<1x8x128xf32> to vector<8x128xf32>
      %cst_38 = arith.constant dense<0.000000e+00> : vector<8x128xf32>
      %90 = vector.multi_reduction <add>, %88, %cst_38 [0] : vector<1x8x128xf32> to vector<8x128xf32>
      %cst_39 = arith.constant 4.000000e+00 : f32
      %91 = vector.broadcast %cst_39 : f32 to vector<8x128xf32>
      %92 = arith.cmpf oeq, %46, %91 : vector<8x128xf32>
      %cst_40 = arith.constant 1.000000e+00 : f32
      %cst_41 = arith.constant 0.000000e+00 : f32
      %93 = vector.broadcast %cst_40 : f32 to vector<8x128xf32>
      %94 = vector.broadcast %cst_41 : f32 to vector<8x128xf32>
      %95 = arith.select %92, %93, %94 : vector<8x128xi1>, vector<8x128xf32>
      %96 = vector.shape_cast %95 : vector<8x128xf32> to vector<1x8x128xf32>
      %cst_42 = arith.constant 0.000000e+00 : f32
      %97 = vector.broadcast %cst_42 : f32 to vector<8x128xf32>
      %98 = arith.select %92, %29, %97 : vector<8x128xi1>, vector<8x128xf32>
      %99 = vector.shape_cast %98 : vector<8x128xf32> to vector<1x8x128xf32>
      %cst_43 = arith.constant dense<0.000000e+00> : vector<8x128xf32>
      %100 = vector.multi_reduction <add>, %96, %cst_43 [0] : vector<1x8x128xf32> to vector<8x128xf32>
      %cst_44 = arith.constant dense<0.000000e+00> : vector<8x128xf32>
      %101 = vector.multi_reduction <add>, %99, %cst_44 [0] : vector<1x8x128xf32> to vector<8x128xf32>
      %cst_45 = arith.constant 5.000000e+00 : f32
      %102 = vector.broadcast %cst_45 : f32 to vector<8x128xf32>
      %103 = arith.cmpf oeq, %46, %102 : vector<8x128xf32>
      %cst_46 = arith.constant 1.000000e+00 : f32
      %cst_47 = arith.constant 0.000000e+00 : f32
      %104 = vector.broadcast %cst_46 : f32 to vector<8x128xf32>
      %105 = vector.broadcast %cst_47 : f32 to vector<8x128xf32>
      %106 = arith.select %103, %104, %105 : vector<8x128xi1>, vector<8x128xf32>
      %107 = vector.shape_cast %106 : vector<8x128xf32> to vector<1x8x128xf32>
      %cst_48 = arith.constant 0.000000e+00 : f32
      %108 = vector.broadcast %cst_48 : f32 to vector<8x128xf32>
      %109 = arith.select %103, %29, %108 : vector<8x128xi1>, vector<8x128xf32>
      %110 = vector.shape_cast %109 : vector<8x128xf32> to vector<1x8x128xf32>
      %cst_49 = arith.constant dense<0.000000e+00> : vector<8x128xf32>
      %111 = vector.multi_reduction <add>, %107, %cst_49 [0] : vector<1x8x128xf32> to vector<8x128xf32>
      %cst_50 = arith.constant dense<0.000000e+00> : vector<8x128xf32>
      %112 = vector.multi_reduction <add>, %110, %cst_50 [0] : vector<1x8x128xf32> to vector<8x128xf32>
      %cst_51 = arith.constant 6.000000e+00 : f32
      %113 = vector.broadcast %cst_51 : f32 to vector<8x128xf32>
      %114 = arith.cmpf oeq, %46, %113 : vector<8x128xf32>
      %cst_52 = arith.constant 1.000000e+00 : f32
      %cst_53 = arith.constant 0.000000e+00 : f32
      %115 = vector.broadcast %cst_52 : f32 to vector<8x128xf32>
      %116 = vector.broadcast %cst_53 : f32 to vector<8x128xf32>
      %117 = arith.select %114, %115, %116 : vector<8x128xi1>, vector<8x128xf32>
      %118 = vector.shape_cast %117 : vector<8x128xf32> to vector<1x8x128xf32>
      %cst_54 = arith.constant 0.000000e+00 : f32
      %119 = vector.broadcast %cst_54 : f32 to vector<8x128xf32>
      %120 = arith.select %114, %29, %119 : vector<8x128xi1>, vector<8x128xf32>
      %121 = vector.shape_cast %120 : vector<8x128xf32> to vector<1x8x128xf32>
      %cst_55 = arith.constant dense<0.000000e+00> : vector<8x128xf32>
      %122 = vector.multi_reduction <add>, %118, %cst_55 [0] : vector<1x8x128xf32> to vector<8x128xf32>
      %cst_56 = arith.constant dense<0.000000e+00> : vector<8x128xf32>
      %123 = vector.multi_reduction <add>, %121, %cst_56 [0] : vector<1x8x128xf32> to vector<8x128xf32>
      %cst_57 = arith.constant 7.000000e+00 : f32
      %124 = vector.broadcast %cst_57 : f32 to vector<8x128xf32>
      %125 = arith.cmpf oeq, %46, %124 : vector<8x128xf32>
      %cst_58 = arith.constant 1.000000e+00 : f32
      %cst_59 = arith.constant 0.000000e+00 : f32
      %126 = vector.broadcast %cst_58 : f32 to vector<8x128xf32>
      %127 = vector.broadcast %cst_59 : f32 to vector<8x128xf32>
      %128 = arith.select %125, %126, %127 : vector<8x128xi1>, vector<8x128xf32>
      %129 = vector.shape_cast %128 : vector<8x128xf32> to vector<1x8x128xf32>
      %cst_60 = arith.constant 0.000000e+00 : f32
      %130 = vector.broadcast %cst_60 : f32 to vector<8x128xf32>
      %131 = arith.select %125, %29, %130 : vector<8x128xi1>, vector<8x128xf32>
      %132 = vector.shape_cast %131 : vector<8x128xf32> to vector<1x8x128xf32>
      %cst_61 = arith.constant dense<0.000000e+00> : vector<8x128xf32>
      %133 = vector.multi_reduction <add>, %129, %cst_61 [0] : vector<1x8x128xf32> to vector<8x128xf32>
      %cst_62 = arith.constant dense<0.000000e+00> : vector<8x128xf32>
      %134 = vector.multi_reduction <add>, %132, %cst_62 [0] : vector<1x8x128xf32> to vector<8x128xf32>
      %cst_63 = arith.constant 8.000000e+00 : f32
      %135 = vector.broadcast %cst_63 : f32 to vector<8x128xf32>
      %136 = arith.cmpf oeq, %46, %135 : vector<8x128xf32>
      %cst_64 = arith.constant 1.000000e+00 : f32
      %cst_65 = arith.constant 0.000000e+00 : f32
      %137 = vector.broadcast %cst_64 : f32 to vector<8x128xf32>
      %138 = vector.broadcast %cst_65 : f32 to vector<8x128xf32>
      %139 = arith.select %136, %137, %138 : vector<8x128xi1>, vector<8x128xf32>
      %140 = vector.shape_cast %139 : vector<8x128xf32> to vector<1x8x128xf32>
      %cst_66 = arith.constant 0.000000e+00 : f32
      %141 = vector.broadcast %cst_66 : f32 to vector<8x128xf32>
      %142 = arith.select %136, %29, %141 : vector<8x128xi1>, vector<8x128xf32>
      %143 = vector.shape_cast %142 : vector<8x128xf32> to vector<1x8x128xf32>
      %cst_67 = arith.constant dense<0.000000e+00> : vector<8x128xf32>
      %144 = vector.multi_reduction <add>, %140, %cst_67 [0] : vector<1x8x128xf32> to vector<8x128xf32>
      %cst_68 = arith.constant dense<0.000000e+00> : vector<8x128xf32>
      %145 = vector.multi_reduction <add>, %143, %cst_68 [0] : vector<1x8x128xf32> to vector<8x128xf32>
      %cst_69 = arith.constant 9.000000e+00 : f32
      %146 = vector.broadcast %cst_69 : f32 to vector<8x128xf32>
      %147 = arith.cmpf oeq, %46, %146 : vector<8x128xf32>
      %cst_70 = arith.constant 1.000000e+00 : f32
      %cst_71 = arith.constant 0.000000e+00 : f32
      %148 = vector.broadcast %cst_70 : f32 to vector<8x128xf32>
      %149 = vector.broadcast %cst_71 : f32 to vector<8x128xf32>
      %150 = arith.select %147, %148, %149 : vector<8x128xi1>, vector<8x128xf32>
      %151 = vector.shape_cast %150 : vector<8x128xf32> to vector<1x8x128xf32>
      %cst_72 = arith.constant 0.000000e+00 : f32
      %152 = vector.broadcast %cst_72 : f32 to vector<8x128xf32>
      %153 = arith.select %147, %29, %152 : vector<8x128xi1>, vector<8x128xf32>
      %154 = vector.shape_cast %153 : vector<8x128xf32> to vector<1x8x128xf32>
      %cst_73 = arith.constant dense<0.000000e+00> : vector<8x128xf32>
      %155 = vector.multi_reduction <add>, %151, %cst_73 [0] : vector<1x8x128xf32> to vector<8x128xf32>
      %cst_74 = arith.constant dense<0.000000e+00> : vector<8x128xf32>
      %156 = vector.multi_reduction <add>, %154, %cst_74 [0] : vector<1x8x128xf32> to vector<8x128xf32>
      %c0_75 = arith.constant 0 : index
      %c0_76 = arith.constant 0 : index
      %c0_77 = arith.constant 0 : index
      %c0_78 = arith.constant 0 : index
      %157 = vector.load %arg4[%c0_75, %c0_76, %c0_77, %c0_78] : memref<1x10x8x128xf32, #tpu.memory_space<vmem>>, vector<1x10x8x128xf32>
      %158 = vector.shape_cast %157 : vector<1x10x8x128xf32> to vector<10x8x128xf32>
      %159 = vector.shape_cast %56 : vector<8x128xf32> to vector<1x8x128xf32>
      %160 = vector.shape_cast %67 : vector<8x128xf32> to vector<1x8x128xf32>
      %161 = vector.shape_cast %78 : vector<8x128xf32> to vector<1x8x128xf32>
      %162 = vector.shape_cast %89 : vector<8x128xf32> to vector<1x8x128xf32>
      %163 = vector.shape_cast %100 : vector<8x128xf32> to vector<1x8x128xf32>
      %164 = vector.shape_cast %111 : vector<8x128xf32> to vector<1x8x128xf32>
      %165 = vector.shape_cast %122 : vector<8x128xf32> to vector<1x8x128xf32>
      %166 = vector.shape_cast %133 : vector<8x128xf32> to vector<1x8x128xf32>
      %167 = vector.shape_cast %144 : vector<8x128xf32> to vector<1x8x128xf32>
      %168 = vector.shape_cast %155 : vector<8x128xf32> to vector<1x8x128xf32>
      %169 = tpu.concatenate %159, %160, %161, %162, %163, %164, %165, %166, %167, %168 in 0 : vector<1x8x128xf32>, vector<1x8x128xf32>, vector<1x8x128xf32>, vector<1x8x128xf32>, vector<1x8x128xf32>, vector<1x8x128xf32>, vector<1x8x128xf32>, vector<1x8x128xf32>, vector<1x8x128xf32>, vector<1x8x128xf32> -> vector<10x8x128xf32>
      %170 = arith.addf %158, %169 : vector<10x8x128xf32>
      %c0_79 = arith.constant 0 : index
      %c0_80 = arith.constant 0 : index
      %c0_81 = arith.constant 0 : index
      %c0_82 = arith.constant 0 : index
      %171 = vector.load %arg4[%c0_79, %c0_80, %c0_81, %c0_82] : memref<1x10x8x128xf32, #tpu.memory_space<vmem>>, vector<1x10x8x128xf32>
      %172 = vector.shape_cast %171 : vector<1x10x8x128xf32> to vector<10x8x128xf32>
      %173 = vector.shape_cast %170 : vector<10x8x128xf32> to vector<1x10x8x128xf32>
      tpu.vector_store %arg4[%c0_79, %c0_80, %c0_81, %c0_82], %173 {strides = array<i32>} : memref<1x10x8x128xf32, #tpu.memory_space<vmem>>, vector<1x10x8x128xf32>,
      %c0_83 = arith.constant 0 : index
      %c0_84 = arith.constant 0 : index
      %c0_85 = arith.constant 0 : index
      %c0_86 = arith.constant 0 : index
      %174 = vector.load %arg5[%c0_83, %c0_84, %c0_85, %c0_86] : memref<1x10x8x128xf32, #tpu.memory_space<vmem>>, vector<1x10x8x128xf32>
      %175 = vector.shape_cast %174 : vector<1x10x8x128xf32> to vector<10x8x128xf32>
      %176 = vector.shape_cast %57 : vector<8x128xf32> to vector<1x8x128xf32>
      %177 = vector.shape_cast %68 : vector<8x128xf32> to vector<1x8x128xf32>
      %178 = vector.shape_cast %79 : vector<8x128xf32> to vector<1x8x128xf32>
      %179 = vector.shape_cast %90 : vector<8x128xf32> to vector<1x8x128xf32>
      %180 = vector.shape_cast %101 : vector<8x128xf32> to vector<1x8x128xf32>
      %181 = vector.shape_cast %112 : vector<8x128xf32> to vector<1x8x128xf32>
      %182 = vector.shape_cast %123 : vector<8x128xf32> to vector<1x8x128xf32>
      %183 = vector.shape_cast %134 : vector<8x128xf32> to vector<1x8x128xf32>
      %184 = vector.shape_cast %145 : vector<8x128xf32> to vector<1x8x128xf32>
      %185 = vector.shape_cast %156 : vector<8x128xf32> to vector<1x8x128xf32>
      %186 = tpu.concatenate %176, %177, %178, %179, %180, %181, %182, %183, %184, %185 in 0 : vector<1x8x128xf32>, vector<1x8x128xf32>, vector<1x8x128xf32>, vector<1x8x128xf32>, vector<1x8x128xf32>, vector<1x8x128xf32>, vector<1x8x128xf32>, vector<1x8x128xf32>, vector<1x8x128xf32>, vector<1x8x128xf32> -> vector<10x8x128xf32>
      %187 = arith.addf %175, %186 : vector<10x8x128xf32>
      %c0_87 = arith.constant 0 : index
      %c0_88 = arith.constant 0 : index
      %c0_89 = arith.constant 0 : index
      %c0_90 = arith.constant 0 : index
      %188 = vector.load %arg5[%c0_87, %c0_88, %c0_89, %c0_90] : memref<1x10x8x128xf32, #tpu.memory_space<vmem>>, vector<1x10x8x128xf32>
      %189 = vector.shape_cast %188 : vector<1x10x8x128xf32> to vector<10x8x128xf32>
      %190 = vector.shape_cast %187 : vector<10x8x128xf32> to vector<1x10x8x128xf32>
      tpu.vector_store %arg5[%c0_87, %c0_88, %c0_89, %c0_90], %190 {strides = array<i32>} : memref<1x10x8x128xf32, #tpu.memory_space<vmem>>, vector<1x10x8x128xf32>,
    } else {
    }
    return
  }
  func.func @transform_0(%arg0: i32, %arg1: i32) -> (i32, i32) {
    %c2_i32 = arith.constant 2 : i32
    %0 = arith.muli %arg0, %c2_i32 : i32
    %1 = arith.addi %0, %arg1 : i32
    %c2_i32_0 = arith.constant 2 : i32
    %2 = arith.minsi %1, %c2_i32_0 : i32
    %c0_i32 = arith.constant 0 : i32
    %c0_i32_1 = arith.constant 0 : i32
    return %2, %c0_i32 : i32, i32
  }
  func.func @transform_1(%arg0: i32, %arg1: i32) -> (i32, i32) {
    %c2_i32 = arith.constant 2 : i32
    %0 = arith.muli %arg0, %c2_i32 : i32
    %1 = arith.addi %0, %arg1 : i32
    %c2_i32_0 = arith.constant 2 : i32
    %2 = arith.minsi %1, %c2_i32_0 : i32
    %c0_i32 = arith.constant 0 : i32
    %c0_i32_1 = arith.constant 0 : i32
    return %2, %c0_i32 : i32, i32
  }
  func.func @transform_2(%arg0: i32, %arg1: i32) -> (i32, i32, i32, i32) {
    %c0_i32 = arith.constant 0 : i32
    %c0_i32_0 = arith.constant 0 : i32
    %c0_i32_1 = arith.constant 0 : i32
    %c0_i32_2 = arith.constant 0 : i32
    return %arg0, %c0_i32, %c0_i32_0, %c0_i32_1 : i32, i32, i32, i32
  }
  func.func @transform_3(%arg0: i32, %arg1: i32) -> (i32, i32, i32, i32) {
    %c0_i32 = arith.constant 0 : i32
    %c0_i32_0 = arith.constant 0 : i32
    %c0_i32_1 = arith.constant 0 : i32
    %c0_i32_2 = arith.constant 0 : i32
    return %arg0, %c0_i32, %c0_i32_0, %c0_i32_1 : i32, i32, i32, i32
  }
}

</mosaic_0001>

<bundles_post_ra>
// kernel: _ghm_forward.1
= control target key start
LH: loop header
LB: loop body
LE: loop exit
PB: predicated region body
PF: predicated region fallthrough
CT: control target
= control target key end

     0   :  { %s1342_s0 = inlined_call_operand.hbm [shape: f32[20,128], index: 0, kind: input, shape index: {}]   ;;  %s1343_s1 = inlined_call_operand.hbm [shape: f32[20,128], index: 1, kind: input, shape index: {}]   ;;  %s1344_s2 = inlined_call_operand.vmem [shape: f32[2,10,8,128], index: 2, kind: output, shape index: {0}]   ;;  %s1345_s3 = inlined_call_operand.vmem [shape: f32[2,10,8,128], index: 3, kind: output, shape index: {1}]  }
   0x1   :  { %1346 = sst [smem:[#allocation8_spill]] %s1342_s0 }
   0x2   :  { %9 = vsyncpa [#allocation3], 0 }
   0x3   :  { %11 = vsyncpa [#allocation3 + $0x1], 0 }
   0x4   :  { %12 = vsyncpa [#allocation5], 0 }
   0x5   :  { %14 = vsyncpa [#allocation5 + $0x1], 0  ;;  %s970_s12 = smov 0   ;;  %s972_s13 = smov 0  }
   0x6   :  { %s974_s14 = smov 0   ;;  %s976_s15 = smov 0  }
   0x7   :  { %s978_s16 = smov 0   ;;  %s980_s17 = smov 0  }
   0x8   :  { %s982_s18 = smov 0   ;;  %s984_s19 = smov 0  }
   0x9 LB: > { %s703_s20 = sadd.s32 4294967295, %s945_s19   ;;  %s29_s21 = sadd.s32 1, %s937_s17  ;;  %s945_s19 = sphi %s984_s19, %s20_s19   ;;  %s941_s18 = sphi %s982_s18, %s1356_s18   ;;  %s937_s17 = sphi %s980_s17, %s1355_s17   ;;  %s933_s16 = sphi %s978_s16, %s1354_s16   ;;  %s929_s15 = sphi %s976_s15, %s1353_s15   ;;  %s925_s14 = sphi %s974_s14, %s1352_s14   ;;  %s921_s13 = sphi %s972_s13, %s1351_s13   ;;  %s917_s12 = sphi %s970_s12, %s1350_s12  }
   0xa   : > { %p30_p0 = scmp.ge.s32.totalorder %s29_s21, 2  ;;  %s32_s22 = sadd.s32 1, %s941_s18 }
   0xb   : > { %s705_s23 = sshll.u32 %s941_s18, 1  ;;  %s47_s24 = sadd.s32 1, %s925_s14 }
   0xc   : > { %s1358_s21 = smov (%p30_p0, %s29_s21), 0  ;;  %s1360_s22 = smov (!%p30_p0, %s32_s22), %s941_s18 }
   0xd   : > { %s37_s25 = sadd.s32 %s937_s17, %s705_s23  ;;  %p54_p1 = scmp.ne.s32.totalorder %s925_s14, %s921_s13 }
   0xe   : > { %p34_p2 = scmp.ge.s32.totalorder %s1360_s22, 2  ;;  %p38_p3 = scmp.lt.s32.totalorder %s37_s25, 2 }
   0xf   : > { %p55_p4 = scmp.eq.s32.totalorder %s945_s19, 0  ;;  %p60_p5 = scmp.ne.s32.totalorder %s921_s13, %s917_s12 }
  0x10   : > { %s1362_s22 = smov (%p34_p2, %s1360_s22), 0  ;;  %s1364_s25 = smov (!%p38_p3, %s37_s25), 2 }
  0x11   : > { %s706_s26 = sshll.u32 %s1362_s22, 1  ;;  %p1024_p6 = por %p55_p4, %p54_p1 }
  0x12   : > { %s41_s28 = sadd.s32 %s706_s26, %s1358_s21  ;;  %p61_p7 = scmp.eq.s32.totalorder %s703_s20, 0 }
  0x13   : > { %p42_p8 = scmp.lt.s32.totalorder %s41_s28, 2  ;;  %p741_p10 = scmp.lt.s32.totalorder %s945_s19, 4 }
  0x14   : > { %p1029_p9 = por %p61_p7, %p60_p5  ;;  %s170_s30 = sand.u32 1, %s925_s14  }
  0x15   : > { %s1366_s28 = smov (!%p42_p8, %s41_s28), 2  ;;  %s713_s4 = sshll.u32 %s1364_s25, 3 }
  0x16   : > { %s44_s5 = ssub.s32 %s1364_s25, %s1366_s28  ;;  %s711_s6 = sshll.u32 %s170_s30, 3 }
  0x17   : > { %p45_p11 = scmp.eq.s32.totalorder %s44_s5, 0  ;;  %s1349_s0 = sld [smem:[#allocation8_spill]] }
  0x18   : > { %s174_s12 = scalar_lea.vmem [#allocation2], %s711_s6  ;;  %p735_p12 = pnand %p741_p10, %p1024_p6 }
  0x19   : > { %s1039_s10 = scalar_select %p45_p11, %s925_s14, %s47_s24  }
  0x1a   : > { %s186_s20 = sshll.u32 %s174_s12, 4  ;;  %p717_p13 = scmp.ge.s32.totalorder %s945_s19, 1  ;;  %s187_s20 = int_to_ptr.vmem [resolvable:$true] %s186_s20 }
  0x1b   : > { %p214_p0 = scmp.lt.s32.totalorder %s945_s19, 5  ;;  %s171_s23 = scalar_lea.sflag [#allocation3], %s170_s30 }
  0x1c   : > { %s205_s28 = scalar_lea.hbm %s1343_s1, %s713_s4  ;;  %s197_s24 = scalar_lea.vmem [#allocation4], %s711_s6 }
  0x1d   : > { %s182_s9 = scalar_lea.hbm %s1349_s0, %s713_s4  ;;  %p215_p1 = pnand %p717_p13, %p214_p0 }
  0x1e   : > { %s184_s11 = sshll.u32 %s182_s9, 4  ;;  %s207_s5 = sshll.u32 %s205_s28, 4  ;;  %s185_s11 = int_to_ptr.hbm [resolvable:$true] %s184_s11  ;;  %s208_s5 = int_to_ptr.hbm [resolvable:$true] %s207_s5 }
  0x1f   : > { %737 = dma.hbm_to_vmem [thread:$0]  (!%p735_p12), %s185_s11, 128, %s187_s20, %s171_s23  }
  0x20   : > { %s209_s7 = sshll.u32 %s197_s24, 4  ;;  %s194_s8 = scalar_lea.sflag [#allocation5], %s170_s30  ;;  %s210_s7 = int_to_ptr.vmem [resolvable:$true] %s209_s7 }
  0x21   : > { %740 = dma.hbm_to_vmem [thread:$0]  (!%p735_p12), %s208_s5, 128, %s210_s7, %s194_s8  }
  0x22   : > { %218 = sbr.rel (%p215_p1) target bundleno = 168 (0xa8), region = 28  ;;  %s220_s27 = sand.u32 (!%p215_p1), 1, %s921_s13  }
  0x23   : > { %s718_s9 = sshll.u32 (!%p215_p1), %s220_s27, 3  ;;  %s221_s12 = scalar_lea.sflag (!%p215_p1), [#allocation3], %s220_s27 }
  0x24   : > { %s1051_s0 = scalar_lea.vmem (!%p215_p1), [#allocation2], %s718_s9 }
  0x27   : > { %908 = dma.done.wait (%p1029_p9), %s221_s12, 128  }
  0x28   : > { %910 = vsyncadd (%p1029_p9), %s221_s12, 4294967168  ;;  %s231_s4 = scalar_lea.sflag [#allocation5], %s220_s27  ;;  %s1057_s6 = scalar_lea.vmem [#allocation4], %s718_s9 }
  0x29   : > { %912 = dma.done.wait (%p1029_p9), %s231_s4, 128  }
  0x2a   : > { %914 = vsyncadd (%p1029_p9), %s231_s4, 4294967168  ;;  %p276_p2 = scmp.lt.s32.totalorder %s933_s16, 1  ;;  %p722_p3 = scmp.ne.s32.totalorder %s929_s15, 0 }
  0x2c   : > { %s277_s30 = scalar_select %p276_p2, %s933_s16, 1 }
  0x2d   : > { %289 = sbr.rel (%p722_p3) target bundleno = 71 (0x47), region = 40 }
  0x2e   : > { %s729_s11 = smul.u32 80, %s277_s30 }
  0x30   : > { %s1068_s25 = scalar_lea.vmem %s1344_s2, %s729_s11  ;;  %s1073_s5 = scalar_lea.vmem %s1345_s3, %s729_s11 }
  0x32   : > { %v947_v0 = vmov 0.0  }
  0x33   : > { %290 = vst [vmem:[%s1068_s25] sm:$0xff] %v947_v0 }
  0x34   : > { %291 = vst [vmem:[%s1068_s25 + $0x8] sm:$0xff] %v947_v0 }
  0x35   : > { %292 = vst [vmem:[%s1068_s25 + $0x10] sm:$0xff] %v947_v0 }
  0x36   : > { %293 = vst [vmem:[%s1068_s25 + $0x18] sm:$0xff] %v947_v0 }
  0x37   : > { %294 = vst [vmem:[%s1068_s25 + $0x20] sm:$0xff] %v947_v0 }
  0x38   : > { %295 = vst [vmem:[%s1068_s25 + $0x28] sm:$0xff] %v947_v0 }
  0x39   : > { %296 = vst [vmem:[%s1068_s25 + $0x30] sm:$0xff] %v947_v0 }
  0x3a   : > { %297 = vst [vmem:[%s1068_s25 + $0x38] sm:$0xff] %v947_v0 }
  0x3b   : > { %298 = vst [vmem:[%s1068_s25 + $0x40] sm:$0xff] %v947_v0 }
  0x3c   : > { %299 = vst [vmem:[%s1068_s25 + $0x48] sm:$0xff] %v947_v0 }
  0x3d   : > { %300 = vst [vmem:[%s1073_s5] sm:$0xff] %v947_v0 }
  0x3e   : > { %301 = vst [vmem:[%s1073_s5 + $0x8] sm:$0xff] %v947_v0 }
  0x3f   : > { %302 = vst [vmem:[%s1073_s5 + $0x10] sm:$0xff] %v947_v0 }
  0x40   : > { %303 = vst [vmem:[%s1073_s5 + $0x18] sm:$0xff] %v947_v0 }
  0x41   : > { %304 = vst [vmem:[%s1073_s5 + $0x20] sm:$0xff] %v947_v0 }
  0x42   : > { %305 = vst [vmem:[%s1073_s5 + $0x28] sm:$0xff] %v947_v0 }
  0x43   : > { %306 = vst [vmem:[%s1073_s5 + $0x30] sm:$0xff] %v947_v0 }
  0x44   : > { %307 = vst [vmem:[%s1073_s5 + $0x38] sm:$0xff] %v947_v0 }
  0x45   : > { %308 = vst [vmem:[%s1073_s5 + $0x40] sm:$0xff] %v947_v0 }
  0x46   : > { %309 = vst [vmem:[%s1073_s5 + $0x48] sm:$0xff] %v947_v0 }
  0x47 PF: > { %v310_v1 = vld [vmem:[%s1051_s0] sm:$0xff]  ;;  %s723_s29 = sshll.u32 %s933_s16, 1  ;;  %v311_v7 = vld [vmem:[%s1057_s6] sm:$0xff] }
  0x48   : > { %v312_v2 = vand.u32 2147483647, %v310_v1  ;;  %s1099_s24 = sadd.s32 %s929_s15, %s723_s29  ;;  %v325_v8 = vmax.f32 %v310_v1, 0.0  ;;  %v326_v9 = vmul.f32 %v311_v7, %v310_v1  ;;  %vm318_vm0 = vcmp.ge.f32.partialorder %v310_v1, 0.0 }
  0x49   : > { %s724_s7 = sshll.u32 %s1099_s24, 3 }
  0x4a   : > { %v313_v3 = vsub.f32 0.0, %v312_v2  ;;  %s1104_s8 = sadd.s32 8, %s724_s7  ;;  %v327_v11 = vsub.f32 %v325_v8, %v326_v9 }
  0x4b   : > { %p725_p4 = scmp.gt.s32.totalorder %s1104_s8, 20 }
  0x4c   : > { %v314_v4 = vmul.f32 1.442695, %v313_v3 }
  0x4e   : > { %809 = vpow2.f32 %v314_v4 }
  0x54   : > { %v810_v5 = vpop.eup %809 }
  0x55   : > { %v316_v6 = vadd.f32 1.0, %v810_v5 }
  0x57   : > { %811 = vrcp.f32 %v316_v6 }
  0x58   : > { %813 = vlog2.f32 %v316_v6 }
  0x5d   : > { %v812_v10 = vpop.eup %811 }
  0x5e   : > { %v814_v12 = vpop.eup %813  ;;  %v319_v13 = vsub.f32 1.0, %v812_v10 }
  0x5f   : > { %v329_v14 = vmul.f32 0.6931472, %v814_v12 }
  0x60   : > { %v320_v15 = vsel %vm318_vm0, %v812_v10, %v319_v13 }
  0x61   : > { %v321_v16 = vsub.f32 %v320_v15, %v311_v7  ;;  %v1107_v17 = vadd.f32 %v329_v14, %v327_v11 }
  0x63   : > { %v322_v18 = vand.u32 2147483647, %v321_v16  ;;  %338 = sbr.rel (%p725_p4) target bundleno = 129 (0x81), region = 44 }
  0x65   : > { %v323_v19 = vmul.f32 9.9999, %v322_v18 }
  0x67   : > { %v1109_v20 = vfloor.f32 %v323_v19 }
  0x68   : > { %v389_v21 = vld [vmem:[%s1068_s25] sm:$0xff]  ;;  %v390_v22 = vld [vmem:[%s1068_s25 + $0x8] sm:$0xff]  ;;  %v948_v23 = vmov 0.0   ;;  %v391_v27 = vld [vmem:[%s1068_s25 + $0x10] sm:$0xff] }
  0x69   : > { %vm339_vm1 = vcmp.eq.f32.partialorder %v1109_v20, 0.0  ;;  %vm344_vm2 = vcmp.eq.f32.partialorder %v1109_v20, 1.0  ;;  %vm349_vm3 = vcmp.eq.f32.partialorder %v1109_v20, 2.0  ;;  %vm354_vm4 = vcmp.eq.f32.partialorder %v1109_v20, 3.0  ;;  %v392_v28 = vld [vmem:[%s1068_s25 + $0x18] sm:$0xff]  ;;  %v393_v33 = vld [vmem:[%s1068_s25 + $0x20] sm:$0xff] }
  0x6a   : > { %v340_v24 = vsel %vm339_vm1, 1.0, %v948_v23  ;;  %v345_v25 = vsel %vm344_vm2, 1.0, %v948_v23  ;;  %v350_v26 = vsel %vm349_vm3, 1.0, %v948_v23  ;;  %v355_v32 = vsel %vm354_vm4, 1.0, %v948_v23  ;;  %v394_v34 = vld [vmem:[%s1068_s25 + $0x28] sm:$0xff]  ;;  %v395_v36 = vld [vmem:[%s1068_s25 + $0x30] sm:$0xff] }
  0x6b   : > { %v399_v29 = vadd.f32 %v389_v21, %v340_v24  ;;  %v400_v30 = vadd.f32 %v390_v22, %v345_v25  ;;  %v401_v31 = vadd.f32 %v391_v27, %v350_v26  ;;  %v402_v35 = vadd.f32 %v392_v28, %v355_v32  ;;  %v396_v40 = vld [vmem:[%s1068_s25 + $0x38] sm:$0xff]  ;;  %v397_v44 = vld [vmem:[%s1068_s25 + $0x40] sm:$0xff]  ;;  %v398_v46 = vld [vmem:[%s1068_s25 + $0x48] sm:$0xff] }
  0x6c   : > { %vm359_vm5 = vcmp.eq.f32.partialorder %v1109_v20, 4.0  ;;  %vm364_vm6 = vcmp.eq.f32.partialorder %v1109_v20, 5.0  ;;  %vm369_vm7 = vcmp.eq.f32.partialorder %v1109_v20, 6.0  ;;  %vm374_vm8 = vcmp.eq.f32.partialorder %v1109_v20, 7.0  ;;  %v419_v51 = vld [vmem:[%s1073_s5] sm:$0xff]  ;;  %v420_v54 = vld [vmem:[%s1073_s5 + $0x8] sm:$0xff] }
  0x6d   : > { %409 = vst [vmem:[%s1068_s25] sm:$0xff] %v399_v29  ;;  %v360_v37 = vsel %vm359_vm5, 1.0, %v948_v23  ;;  %v365_v38 = vsel %vm364_vm6, 1.0, %v948_v23  ;;  %v370_v39 = vsel %vm369_vm7, 1.0, %v948_v23  ;;  %v375_v43 = vsel %vm374_vm8, 1.0, %v948_v23  ;;  %v421_v57 = vld [vmem:[%s1073_s5 + $0x10] sm:$0xff]  ;;  %v422_v60 = vld [vmem:[%s1073_s5 + $0x18] sm:$0xff] }
  0x6e   : > { %410 = vst [vmem:[%s1068_s25 + $0x8] sm:$0xff] %v400_v30  ;;  %v403_v41 = vadd.f32 %v393_v33, %v360_v37  ;;  %v404_v42 = vadd.f32 %v394_v34, %v365_v38  ;;  %v405_v45 = vadd.f32 %v395_v36, %v370_v39  ;;  %vm379_vm9 = vcmp.eq.f32.partialorder %v1109_v20, 8.0  ;;  %v423_v63 = vld [vmem:[%s1073_s5 + $0x20] sm:$0xff]  ;;  %v424_v2 = vld [vmem:[%s1073_s5 + $0x28] sm:$0xff]  ;;  %v425_v5 = vld [vmem:[%s1073_s5 + $0x30] sm:$0xff] }
  0x6f   : > { %411 = vst [vmem:[%s1068_s25 + $0x10] sm:$0xff] %v401_v31  ;;  %vm384_vm10 = vcmp.eq.f32.partialorder %v1109_v20, 9.0  ;;  %v406_v47 = vadd.f32 %v396_v40, %v375_v43  ;;  %v380_v48 = vsel %vm379_vm9, 1.0, %v948_v23  ;;  %v341_v50 = vsel %vm339_vm1, %v1107_v17, 0.0  ;;  %v426_v8 = vld [vmem:[%s1073_s5 + $0x38] sm:$0xff]  ;;  %v427_v11 = vld [vmem:[%s1073_s5 + $0x40] sm:$0xff] }
  0x70   : > { %412 = vst [vmem:[%s1068_s25 + $0x18] sm:$0xff] %v402_v35  ;;  %v385_v49 = vsel %vm384_vm10, 1.0, %v948_v23  ;;  %v407_v52 = vadd.f32 %v397_v44, %v380_v48  ;;  %v346_v53 = vsel %vm344_vm2, %v1107_v17, 0.0  ;;  %v351_v56 = vsel %vm349_vm3, %v1107_v17, 0.0  ;;  %v428_v14 = vld [vmem:[%s1073_s5 + $0x48] sm:$0xff] }
  0x71   : > { %413 = vst [vmem:[%s1068_s25 + $0x20] sm:$0xff] %v403_v41  ;;  %v408_v55 = vadd.f32 %v398_v46, %v385_v49  ;;  %v429_v58 = vadd.f32 %v419_v51, %v341_v50  ;;  %v356_v59 = vsel %vm354_vm4, %v1107_v17, 0.0  ;;  %v430_v61 = vadd.f32 %v420_v54, %v346_v53 }
  0x72   : > { %414 = vst [vmem:[%s1068_s25 + $0x28] sm:$0xff] %v404_v42  ;;  %v361_v62 = vsel %vm359_vm5, %v1107_v17, 0.0  ;;  %v431_v0 = vadd.f32 %v421_v57, %v351_v56  ;;  %v366_v1 = vsel %vm364_vm6, %v1107_v17, 0.0  ;;  %v432_v3 = vadd.f32 %v422_v60, %v356_v59 }
  0x73   : > { %415 = vst [vmem:[%s1068_s25 + $0x30] sm:$0xff] %v405_v45  ;;  %v371_v4 = vsel %vm369_vm7, %v1107_v17, 0.0  ;;  %v433_v6 = vadd.f32 %v423_v63, %v361_v62  ;;  %v376_v7 = vsel %vm374_vm8, %v1107_v17, 0.0  ;;  %v434_v9 = vadd.f32 %v424_v2, %v366_v1 }
  0x74   : > { %416 = vst [vmem:[%s1068_s25 + $0x38] sm:$0xff] %v406_v47  ;;  %v381_v10 = vsel %vm379_vm9, %v1107_v17, 0.0  ;;  %v435_v12 = vadd.f32 %v425_v5, %v371_v4  ;;  %v386_v13 = vsel %vm384_vm10, %v1107_v17, 0.0  ;;  %v436_v15 = vadd.f32 %v426_v8, %v376_v7 }
  0x75   : > { %417 = vst [vmem:[%s1068_s25 + $0x40] sm:$0xff] %v407_v52  ;;  %v437_v16 = vadd.f32 %v427_v11, %v381_v10  ;;  %v438_v18 = vadd.f32 %v428_v14, %v386_v13 }
  0x76   : > { %418 = vst [vmem:[%s1068_s25 + $0x48] sm:$0xff] %v408_v55 }
  0x77   : > { %439 = vst [vmem:[%s1073_s5] sm:$0xff] %v429_v58 }
  0x78   : > { %440 = vst [vmem:[%s1073_s5 + $0x8] sm:$0xff] %v430_v61 }
  0x79   : > { %441 = vst [vmem:[%s1073_s5 + $0x10] sm:$0xff] %v431_v0 }
  0x7a   : > { %442 = vst [vmem:[%s1073_s5 + $0x18] sm:$0xff] %v432_v3 }
  0x7b   : > { %443 = vst [vmem:[%s1073_s5 + $0x20] sm:$0xff] %v433_v6 }
  0x7c   : > { %444 = vst [vmem:[%s1073_s5 + $0x28] sm:$0xff] %v434_v9 }
  0x7d   : > { %445 = vst [vmem:[%s1073_s5 + $0x30] sm:$0xff] %v435_v12 }
  0x7e   : > { %446 = vst [vmem:[%s1073_s5 + $0x38] sm:$0xff] %v436_v15 }
  0x7f   : > { %447 = vst [vmem:[%s1073_s5 + $0x40] sm:$0xff] %v437_v16 }
  0x80   : > { %448 = vst [vmem:[%s1073_s5 + $0x48] sm:$0xff] %v438_v18 }
  0x81 PF: > { %p726_p5 = scmp.le.s32.totalorder %s1104_s8, 20 }
  0x83   : > { %452 = sbr.rel (%p726_p5) target bundleno = 168 (0xa8), region = 48 }
  0x88   : > { %v453_v19 = vlaneseq  ;;  %v455_v21 = vstv %s724_s7  ;;  %v509_v24 = vld [vmem:[%s1068_s25] sm:$0xff]  ;;  %v510_v26 = vld [vmem:[%s1068_s25 + $0x8] sm:$0xff]  ;;  %v511_v27 = vld [vmem:[%s1068_s25 + $0x10] sm:$0xff]  ;;  %v949_v29 = vmov 0.0  }
  0x89   : > { %v512_v28 = vld [vmem:[%s1068_s25 + $0x18] sm:$0xff]  ;;  %v513_v37 = vld [vmem:[%s1068_s25 + $0x20] sm:$0xff]  ;;  %v514_v38 = vld [vmem:[%s1068_s25 + $0x28] sm:$0xff] }
  0x8a   : > { %v454_v22 = vshrl.u32 %v453_v19, 7  ;;  %v515_v39 = vld [vmem:[%s1068_s25 + $0x30] sm:$0xff]  ;;  %v516_v44 = vld [vmem:[%s1068_s25 + $0x38] sm:$0xff]  ;;  %v517_v47 = vld [vmem:[%s1068_s25 + $0x40] sm:$0xff] }
  0x8b   : > { %v518_v49 = vld [vmem:[%s1068_s25 + $0x48] sm:$0xff]  ;;  %v539_v54 = vld [vmem:[%s1073_s5] sm:$0xff]  ;;  %v541_v60 = vld [vmem:[%s1073_s5 + $0x10] sm:$0xff] }
  0x8c   : > { %v456_v23 = vadd.s32 %v455_v21, %v454_v22  ;;  %v540_v57 = vld [vmem:[%s1073_s5 + $0x8] sm:$0xff]  ;;  %v542_v63 = vld [vmem:[%s1073_s5 + $0x18] sm:$0xff]  ;;  %v543_v2 = vld [vmem:[%s1073_s5 + $0x20] sm:$0xff] }
  0x8d   : > { %v544_v5 = vld [vmem:[%s1073_s5 + $0x28] sm:$0xff]  ;;  %v545_v8 = vld [vmem:[%s1073_s5 + $0x30] sm:$0xff]  ;;  %v546_v11 = vld [vmem:[%s1073_s5 + $0x38] sm:$0xff] }
  0x8e   : > { %vm457_vm11 = vcmp.lt.s32.totalorder %v456_v23, 20  ;;  %v547_v14 = vld [vmem:[%s1073_s5 + $0x40] sm:$0xff]  ;;  %v548_v18 = vld [vmem:[%s1073_s5 + $0x48] sm:$0xff] }
  0x8f   : > { %v1217_v25 = vsel %vm457_vm11, %v1109_v20, -1.0 }
  0x90   : > { %vm459_vm12 = vcmp.eq.f32.partialorder %v1217_v25, 0.0  ;;  %vm464_vm13 = vcmp.eq.f32.partialorder %v1217_v25, 1.0  ;;  %vm469_vm14 = vcmp.eq.f32.partialorder %v1217_v25, 2.0  ;;  %vm474_vm15 = vcmp.eq.f32.partialorder %v1217_v25, 3.0 }
  0x91   : > { %v460_v20 = vsel %vm459_vm12, 1.0, %v949_v29  ;;  %v465_v30 = vsel %vm464_vm13, 1.0, %v949_v29  ;;  %v470_v31 = vsel %vm469_vm14, 1.0, %v949_v29  ;;  %v475_v32 = vsel %vm474_vm15, 1.0, %v949_v29 }
  0x92   : > { %v519_v33 = vadd.f32 %v509_v24, %v460_v20  ;;  %v520_v34 = vadd.f32 %v510_v26, %v465_v30  ;;  %v521_v35 = vadd.f32 %v511_v27, %v470_v31  ;;  %v522_v36 = vadd.f32 %v512_v28, %v475_v32 }
  0x93   : > { %vm479_vm0 = vcmp.eq.f32.partialorder %v1217_v25, 4.0  ;;  %vm484_vm1 = vcmp.eq.f32.partialorder %v1217_v25, 5.0  ;;  %vm489_vm2 = vcmp.eq.f32.partialorder %v1217_v25, 6.0  ;;  %vm494_vm3 = vcmp.eq.f32.partialorder %v1217_v25, 7.0 }
  0x94   : > { %529 = vst [vmem:[%s1068_s25] sm:$0xff] %v519_v33  ;;  %v480_v40 = vsel %vm479_vm0, 1.0, %v949_v29  ;;  %v485_v41 = vsel %vm484_vm1, 1.0, %v949_v29  ;;  %v490_v42 = vsel %vm489_vm2, 1.0, %v949_v29  ;;  %v495_v43 = vsel %vm494_vm3, 1.0, %v949_v29 }
  0x95   : > { %530 = vst [vmem:[%s1068_s25 + $0x8] sm:$0xff] %v520_v34  ;;  %v523_v45 = vadd.f32 %v513_v37, %v480_v40  ;;  %v524_v46 = vadd.f32 %v514_v38, %v485_v41  ;;  %v525_v48 = vadd.f32 %v515_v39, %v490_v42  ;;  %vm499_vm4 = vcmp.eq.f32.partialorder %v1217_v25, 8.0 }
  0x96   : > { %531 = vst [vmem:[%s1068_s25 + $0x10] sm:$0xff] %v521_v35  ;;  %vm504_vm5 = vcmp.eq.f32.partialorder %v1217_v25, 9.0  ;;  %v526_v50 = vadd.f32 %v516_v44, %v495_v43  ;;  %v500_v51 = vsel %vm499_vm4, 1.0, %v949_v29  ;;  %v461_v53 = vsel %vm459_vm12, %v1107_v17, 0.0 }
  0x97   : > { %532 = vst [vmem:[%s1068_s25 + $0x18] sm:$0xff] %v522_v36  ;;  %v505_v52 = vsel %vm504_vm5, 1.0, %v949_v29  ;;  %v527_v55 = vadd.f32 %v517_v47, %v500_v51  ;;  %v466_v56 = vsel %vm464_vm13, %v1107_v17, 0.0  ;;  %v471_v59 = vsel %vm469_vm14, %v1107_v17, 0.0 }
  0x98   : > { %533 = vst [vmem:[%s1068_s25 + $0x20] sm:$0xff] %v523_v45  ;;  %v528_v58 = vadd.f32 %v518_v49, %v505_v52  ;;  %v549_v61 = vadd.f32 %v539_v54, %v461_v53  ;;  %v476_v62 = vsel %vm474_vm15, %v1107_v17, 0.0  ;;  %v550_v0 = vadd.f32 %v540_v57, %v466_v56 }
  0x99   : > { %534 = vst [vmem:[%s1068_s25 + $0x28] sm:$0xff] %v524_v46  ;;  %v481_v1 = vsel %vm479_vm0, %v1107_v17, 0.0  ;;  %v551_v3 = vadd.f32 %v541_v60, %v471_v59  ;;  %v486_v4 = vsel %vm484_vm1, %v1107_v17, 0.0  ;;  %v552_v6 = vadd.f32 %v542_v63, %v476_v62 }
  0x9a   : > { %535 = vst [vmem:[%s1068_s25 + $0x30] sm:$0xff] %v525_v48  ;;  %v491_v7 = vsel %vm489_vm2, %v1107_v17, 0.0  ;;  %v553_v9 = vadd.f32 %v543_v2, %v481_v1  ;;  %v496_v10 = vsel %vm494_vm3, %v1107_v17, 0.0  ;;  %v554_v12 = vadd.f32 %v544_v5, %v486_v4 }
  0x9b   : > { %536 = vst [vmem:[%s1068_s25 + $0x38] sm:$0xff] %v526_v50  ;;  %v501_v13 = vsel %vm499_vm4, %v1107_v17, 0.0  ;;  %v555_v15 = vadd.f32 %v545_v8, %v491_v7  ;;  %v506_v16 = vsel %vm504_vm5, %v1107_v17, 0.0  ;;  %v556_v19 = vadd.f32 %v546_v11, %v496_v10 }
  0x9c   : > { %537 = vst [vmem:[%s1068_s25 + $0x40] sm:$0xff] %v527_v55  ;;  %v557_v21 = vadd.f32 %v547_v14, %v501_v13  ;;  %v558_v22 = vadd.f32 %v548_v18, %v506_v16 }
  0x9d   : > { %538 = vst [vmem:[%s1068_s25 + $0x48] sm:$0xff] %v528_v58 }
  0x9e   : > { %559 = vst [vmem:[%s1073_s5] sm:$0xff] %v549_v61 }
  0x9f   : > { %560 = vst [vmem:[%s1073_s5 + $0x8] sm:$0xff] %v550_v0 }
  0xa0   : > { %561 = vst [vmem:[%s1073_s5 + $0x10] sm:$0xff] %v551_v3 }
  0xa1   : > { %562 = vst [vmem:[%s1073_s5 + $0x18] sm:$0xff] %v552_v6 }
  0xa2   : > { %563 = vst [vmem:[%s1073_s5 + $0x20] sm:$0xff] %v553_v9 }
  0xa3   : > { %564 = vst [vmem:[%s1073_s5 + $0x28] sm:$0xff] %v554_v12 }
  0xa4   : > { %565 = vst [vmem:[%s1073_s5 + $0x30] sm:$0xff] %v555_v15 }
  0xa5   : > { %566 = vst [vmem:[%s1073_s5 + $0x38] sm:$0xff] %v556_v19 }
  0xa6   : > { %567 = vst [vmem:[%s1073_s5 + $0x40] sm:$0xff] %v557_v21 }
  0xa7   : > { %568 = vst [vmem:[%s1073_s5 + $0x48] sm:$0xff] %v558_v22 }
  0xa8 PF: > { %s20_s19 = sadd.s32 1, %s945_s19   ;;  %s1350_s12 = smov %s921_s13 }
  0xa9   : > { %p17_p6 = scmp.ge.s32.totalorder %s20_s19, 6   ;;  %s1351_s13 = smov %s925_s14 }
  0xaa   : > { %s1352_s14 = smov %s1039_s10  ;;  %s1353_s15 = smov %s937_s17 }
  0xab   : > { %s1354_s16 = smov %s941_s18  ;;  %s1355_s17 = smov %s1358_s21 }
  0xac   : > { %s1356_s18 = smov %s1362_s22  ;;  %19 = sbr.rel (!%p17_p6) target bundleno = 9 (0x9), region = 105 }
  0xb1   :  { %606 = vsyncpa [#allocation3], 1 }
  0xb2   :  { %608 = vsyncpa [#allocation3 + $0x1], 1 }
  0xb3   :  { %609 = vsyncpa [#allocation5], 1 }
  0xb4   :  { %611 = vsyncpa [#allocation5 + $0x1], 1 }

</bundles_post_ra>
